<compile_context>
chip_gen: v6e
topology: v6e:2x2x1
jax: 0.10.0
libtpu: 0.0.40
codegen_flags: <defaults>
</compile_context>

<pallas_src>
import jax
import jax.numpy as jnp
from jax.experimental import pallas as pl
from jax.experimental.pallas import tpu as pltpu


def _hswish_kernel(x_ref, o_ref):
    # Upcast to f32 (free: kernel is HBM-bound), compute x * relu6(x+3) / 6,
    # cast back on the store.
    x = x_ref[...].astype(jnp.float32)
    y = x * jnp.clip(x + 3.0, 0.0, 6.0) / 6.0
    o_ref[...] = y.astype(o_ref.dtype)


def _round_up(n, m):
    return -(-n // m) * m


def hswish(x, *, tile_rows=1024):
    """Elementwise hard-swish matching torch: x * F.relu6(x + 3.0) / 6.0."""
    orig_shape = x.shape
    dtype = x.dtype
    total = int(x.size)
    if total == 0:
        return x

    itemsize = jnp.dtype(dtype).itemsize
    # Sublane packing for this dtype: f32 -> 8, bf16 -> 16, int8/fp8 -> 32.
    sub = 8 * max(1, 4 // itemsize)

    # Fast path: widest lane count (multiple of 128) that divides the flat
    # size -> pure reshape, no pad / slice HBM passes.
    lane = None
    for cand in (1024, 512, 256, 128):
        if total % cand == 0:
            lane = cand
            break

    flat = x.reshape(-1)
    if lane is None:
        # Ragged tail fallback: pad up to a single lane row (hswish(0) == 0,
        # padding is sliced off below so it never leaks into the result).
        # TODO(synk): could instead mask the tail in-kernel via scalar prefetch.
        lane = 1024
        padded_total = _round_up(total, lane)
        flat = jnp.pad(flat, (0, padded_total - total))
    else:
        padded_total = total

    rows = padded_total // lane

    # Block row count: multiple of the sublane packing; split into >=2 grid
    # blocks whenever possible so both v7x TensorCores stream HBM.
    if rows >= 2 * sub:
        tr = min(tile_rows, _round_up(pl.cdiv(rows, 2), sub))
    else:
        tr = rows  # single block equal to the full row extent (always legal)
    grid = (pl.cdiv(rows, tr),)

    x2d = flat.reshape(rows, lane)

    out2d = pl.pallas_call(
        _hswish_kernel,
        out_shape=jax.ShapeDtypeStruct((rows, lane), dtype),
        grid_spec=pl.GridSpec(
            grid=grid,
            in_specs=[pl.BlockSpec((tr, lane), lambda i: (i, 0))],
            out_specs=pl.BlockSpec((tr, lane), lambda i: (i, 0)),
        ),
        compiler_params=pltpu.CompilerParams(
            dimension_semantics=("parallel",),
            vmem_limit_bytes=32 * 1024 * 1024,
        ),
        cost_estimate=pl.CostEstimate(
            flops=5 * total,
            transcendentals=0,
            bytes_accessed=2 * total * itemsize,
        ),
    )(x2d)

    out_flat = out2d.reshape(-1)
    if padded_total != total:
        out_flat = out_flat[:total]
    return out_flat.reshape(orig_shape)


if __name__ == "__main__":
    key = jax.random.PRNGKey(0)
    # Small NCHW input consistent with a conv-activation usage.
    x = jax.random.normal(key, (2, 4, 16, 16), dtype=jnp.float32) * 4.0

    y = hswish(x)
    y = jax.block_until_ready(y)

    # Reference check in plain JAX (same arithmetic as the torch module).
    ref = x * jnp.clip(x + 3.0, 0.0, 6.0) / 6.0
    assert y.shape == x.shape
    assert y.dtype == x.dtype
    assert jnp.allclose(y, ref, atol=1e-6, rtol=1e-6)

    print("KERNEL_OK")
</pallas_src>

<mosaic_0001>
module attributes {stable_mosaic.version = 11 : i64} {
  func.func @_hswish_kernel(%arg0: i32, %arg1: memref<2x1024xf32, #tpu.memory_space<vmem>>, %arg2: memref<2x1024xf32, #tpu.memory_space<vmem>>) attributes {dimension_semantics = [#tpu.dimension_semantics<parallel>], iteration_bounds = array<i64: 1>, scalar_prefetch = 0 : i64, scratch_operands = 0 : i64, tpu.core_type = #tpu.core_type<tc>, window_params = [{transform_indices = @transform_0, window_bounds = array<i64: 2, 1024>}, {transform_indices = @transform_1, window_bounds = array<i64: 2, 1024>}]} {
    %c0 = arith.constant 0 : index
    %c0_0 = arith.constant 0 : index
    %0 = vector.load %arg1[%c0, %c0_0] : memref<2x1024xf32, #tpu.memory_space<vmem>>, vector<2x1024xf32>
    %cst = arith.constant 3.000000e+00 : f32
    %1 = vector.broadcast %cst : f32 to vector<2x1024xf32>
    %2 = arith.addf %0, %1 : vector<2x1024xf32>
    %cst_1 = arith.constant 0.000000e+00 : f32
    %cst_2 = arith.constant 6.000000e+00 : f32
    %3 = vector.broadcast %cst_1 : f32 to vector<2x1024xf32>
    %4 = arith.maximumf %3, %2 : vector<2x1024xf32>
    %5 = vector.broadcast %cst_2 : f32 to vector<2x1024xf32>
    %6 = arith.minimumf %5, %4 : vector<2x1024xf32>
    %7 = arith.mulf %0, %6 : vector<2x1024xf32>
    %cst_3 = arith.constant 6.000000e+00 : f32
    %8 = vector.broadcast %cst_3 : f32 to vector<2x1024xf32>
    %9 = arith.divf %7, %8 : vector<2x1024xf32>
    %c0_4 = arith.constant 0 : index
    %c0_5 = arith.constant 0 : index
    %10 = vector.load %arg2[%c0_4, %c0_5] : memref<2x1024xf32, #tpu.memory_space<vmem>>, vector<2x1024xf32>
    tpu.vector_store %arg2[%c0_4, %c0_5], %9 {strides = array<i32>} : memref<2x1024xf32, #tpu.memory_space<vmem>>, vector<2x1024xf32>,
    return
  }
  func.func @transform_0(%arg0: i32) -> (i32, i32) {
    %c0_i32 = arith.constant 0 : i32
    %c0_i32_0 = arith.constant 0 : i32
    return %arg0, %c0_i32 : i32, i32
  }
  func.func @transform_1(%arg0: i32) -> (i32, i32) {
    %c0_i32 = arith.constant 0 : i32
    %c0_i32_0 = arith.constant 0 : i32
    return %arg0, %c0_i32 : i32, i32
  }
}

</mosaic_0001>

<bundles_post_ra>
// kernel: tpu_custom_call.1
= control target key start
LH: loop header
LB: loop body
LE: loop exit
PB: predicated region body
PF: predicated region fallthrough
CT: control target
= control target key end

     0   :  { %6 = vsyncpa [#allocation3], 0  ;;  %s115_s0 = inlined_call_operand.hbm [shape: f32[2,1024], index: 0, kind: input, shape index: {}]   ;;  %s116_s1 = inlined_call_operand.hbm [shape: f32[2,1024], index: 1, kind: output, shape index: {}]  }
   0x1   :  { %7 = vsyncpa [#allocation4], 0  ;;  %s97_s6 = smov [#allocation2]  }
   0x2   :  { %s14_s7 = sshll.u32 %s97_s6, 4  ;;  %s15_s7 = int_to_ptr.vmem [resolvable:$true] %s14_s7 }
   0x3   :  { %s61_s8 = scalar_lea.vmem %s15_s7, 256  ;;  %p66_p1 = scmp.lt.s32.totalorder %s15_s7, %s15_s7 }
   0x4   :  { %p62_p0 = scmp.ne.s32.totalorder %s15_s7, %s61_s8  ;;  %p67_p2 = scmp.lt.s32.totalorder %s61_s8, %s61_s8 }
   0x6   :  { %p68_p3 = por %p67_p2, %p66_p1 }
   0x8   :  { %p69_p4 = pnand %p68_p3, %p62_p0 }
   0xa   :  { %72 = shalt.err (!%p69_p4)
}
   0xb   :  { %17 = dma.hbm_to_vmem [thread:$0]  %s115_s0, 256, %s15_s7, [#allocation3]  }
   0xc   :  { %93 = dma.done.wait [#allocation3], 256  }
   0xd   :  { %94 = vsyncadd [#allocation3], 4294967040  ;;  %v21_v0 = vld [vmem:[#allocation2] sm:$0xff]  ;;  %v22_v1 = vld [vmem:[#allocation2 + $0x8] sm:$0xff]  ;;  %s98_s11 = smov [#allocation5]  }
   0xe   :  { %v23_v2 = vadd.f32 3.0, %v21_v0  ;;  %v24_v3 = vadd.f32 3.0, %v22_v1  ;;  %s42_s12 = sshll.u32 %s98_s11, 4  ;;  %s43_s12 = int_to_ptr.vmem [resolvable:$true] %s42_s12 }
   0xf   :  { %s73_s0 = scalar_lea.vmem %s43_s12, 256  ;;  %p78_p6 = scmp.lt.s32.totalorder %s43_s12, %s43_s12 }
  0x10   :  { %v25_v4 = vmax.f32 %v23_v2, 0.0  ;;  %v26_v5 = vmax.f32 %v24_v3, 0.0  ;;  %p74_p5 = scmp.ne.s32.totalorder %s43_s12, %s73_s0  ;;  %p79_p7 = scmp.lt.s32.totalorder %s73_s0, %s73_s0 }
  0x12   :  { %v27_v6 = vmin.f32 %v25_v4, 6.0  ;;  %v28_v7 = vmin.f32 %v26_v5, 6.0  ;;  %p80_p8 = por %p79_p7, %p78_p6 }
  0x14   :  { %v29_v8 = vmul.f32 %v27_v6, %v21_v0  ;;  %v30_v9 = vmul.f32 %v28_v7, %v22_v1  ;;  %p81_p9 = pnand %p80_p8, %p74_p5 }
  0x16   :  { %v32_v10 = vmul.f32 0.16666667, %v29_v8  ;;  %v33_v11 = vmul.f32 0.16666667, %v30_v9 }
  0x18   :  { %34 = vst [vmem:[#allocation5] sm:$0xff] %v32_v10  ;;  %35 = vst [vmem:[#allocation5 + $0x8] sm:$0xff] %v33_v11 }
  0x19   :  { %84 = shalt.err (!%p81_p9)
}
  0x1a   :  { %45 = dma.vmem_to_hbm [thread:$0]  %s43_s12, 256, %s116_s1, [#allocation4]  }
  0x1b   :  { %95 = dma.done.wait [#allocation4], 256  }
  0x1c   :  { %96 = vsyncadd [#allocation4], 4294967040 }
  0x1d   :  { %49 = vsyncpa [#allocation3], 1 }
  0x1e   :  { %50 = vsyncpa [#allocation4], 1 }

</bundles_post_ra>
